<compile_context>
chip_gen: v6e
topology: v6e:2x2x1
jax: 0.10.0
libtpu: 0.0.40
codegen_flags: <defaults>
</compile_context>

<pallas_src>
import functools
import math

import jax
import jax.numpy as jnp
from jax import lax
from jax.experimental import pallas as pl
from jax.experimental.pallas import tpu as pltpu

_INV_SQRT2 = 1.0 / math.sqrt(2.0)
_MIB = 1024 * 1024


def _round_up(x: int, m: int) -> int:
    return ((x + m - 1) // m) * m


def _vmem_capacity_bytes() -> int:
    try:
        info = pltpu.get_tpu_info()
        cap = getattr(info, "vmem_capacity_bytes", None)
        if cap:
            return int(cap)
    except Exception:
        pass
    return 64 * _MIB  # conservative fallback (v7x per-TC); v5e/v6e have 128 MiB


def _prediction_head_kernel(x_ref, w_ref, b_ref, gamma_ref, beta_ref, o_ref,
                            *, eps, dout, dout_pad, sub_m):
    # x_ref: (TM, DinP)  w_ref: (DinP, DoutP)  b/gamma/beta: (1, DoutP)
    # o_ref: (TM, DoutP)
    tile_m = x_ref.shape[0]
    n_sub = tile_m // sub_m
    inv_n = 1.0 / float(dout)
    n_pad = float(dout_pad - dout)

    # Hoist the small broadcastable params to f32 once per grid step.
    b_f = b_ref[...].astype(jnp.float32)
    g_f = gamma_ref[...].astype(jnp.float32)
    be_f = beta_ref[...].astype(jnp.float32)

    # Static sub-tile loop: independent matmul / epilogue chains let the LLO
    # scheduler co-issue vmatmul with erf (EUP), VALU and lane reductions (XLU).
    for j in range(n_sub):
        lo, hi = j * sub_m, (j + 1) * sub_m

        # Matmul in native operand dtype (bf16 fast path), f32 accumulation.
        h = jnp.dot(x_ref[lo:hi, :], w_ref[...],
                    preferred_element_type=jnp.float32)
        h = h + b_f

        # erf-based GELU (matches the PyTorch reference `gelu`), f32 epilogue.
        h = h * (0.5 * (1.0 + lax.erf(h * _INV_SQRT2)))

        # TF-style LayerNorm over the true `dout` columns.
        # Padded columns of h are exactly zero (zero-padded W and b, gelu(0)=0),
        # so plain sums equal sums over the true columns. The centered squared
        # sum picks up n_pad * u^2 from padded columns (d = -u there), which we
        # subtract analytically instead of building an iota/where mask.
        u = jnp.sum(h, axis=-1, keepdims=True) * inv_n
        d = h - u
        ssq = jnp.sum(d * d, axis=-1, keepdims=True)
        if dout_pad != dout:
            ssq = ssq - n_pad * (u * u)
        s = ssq * inv_n

        hn = d * lax.rsqrt(s + eps)
        # gamma/beta are zero-padded -> padded output columns are exactly 0
        # (and sliced off in the wrapper anyway).
        o_ref[lo:hi, :] = (g_f * hn + be_f).astype(o_ref.dtype)


def prediction_head_transform(x, w, b, gamma, beta, *, eps=1e-12, tile_m=256):
    """x: (..., Din), w: (Din, Dout), b/gamma/beta: (Dout,)."""
    orig_shape = x.shape
    din = orig_shape[-1]
    assert w.shape[0] == din
    dout = w.shape[1]

    # bf16 fast path: the MXU bf16 path needs both operands bf16; a mixed
    # bf16 x f32 dot falls back to the slower multi-pass path and doubles
    # weight VMEM/DMA bytes.
    if x.dtype == jnp.bfloat16 and w.dtype != jnp.bfloat16:
        w = w.astype(jnp.bfloat16)

    x2 = x.reshape(-1, din)
    M = x2.shape[0]
    m8 = _round_up(M, 8)

    # Lane-dense padding targets.
    din_p = _round_up(din, 128)
    dout_p = _round_up(dout, 128)

    x_isz = jnp.dtype(x2.dtype).itemsize
    w_isz = jnp.dtype(w.dtype).itemsize
    o_isz = x_isz

    # Per-generation VMEM accounting: limit = 75% of physical (headroom for
    # Mosaic internal scratch / spills), budget = limit minus 16 MiB.
    vmem_cap = _vmem_capacity_bytes()
    vmem_limit = int(vmem_cap * 3 // 4)
    vmem_budget = max(24 * _MIB, vmem_limit - 16 * _MIB)

    def _vmem_estimate(tm):
        return (din_p * dout_p * w_isz          # weight (single-buffered)
                + 3 * dout_p * 4                # bias / gamma / beta (single-buffered)
                + 2 * tm * din_p * x_isz        # x (default double buffer)
                + 2 * tm * dout_p * o_isz       # out (default double buffer)
                + 3 * tm * dout_p * 4)          # f32 intermediates (h, d, out)

    # M tile: multiple of 8, <= padded M, shrunk until it fits the budget.
    tile_m = max(8, _round_up(min(tile_m, m8), 8))
    while tile_m > 8 and _vmem_estimate(tile_m) > vmem_budget:
        tile_m = max(8, _round_up(tile_m // 2, 8))

    # Keep >=2 grid steps so ("parallel",) can shard across v7x's two TCs.
    if m8 >= 16:
        tile_m = min(tile_m, _round_up(pl.cdiv(m8, 2), 8))

    # Prefer a tile that divides round_up(M, 8) (avoids a large M pad -> extra
    # HBM copy of the activations) when it costs < 2x the tile height.
    div_tile = 8
    for t in range(tile_m, 7, -8):
        if m8 % t == 0:
            div_tile = t
            break
    if div_tile >= max(8, tile_m // 2):
        tile_m = div_tile

    m_p = _round_up(M, tile_m)

    # Epilogue sub-tiling inside each grid step (2 sub-tiles once tiles are big).
    sub_m = tile_m
    if tile_m >= 128 and (tile_m // 2) % 8 == 0:
        sub_m = tile_m // 2

    # Zero padding is semantically safe: padded Din columns contribute nothing
    # to the dot, padded Dout columns / M rows are sliced off after the call.
    # All pads are guarded so already-aligned shapes emit no copy.
    x_p = x2
    if m_p != M or din_p != din:
        x_p = jnp.pad(x2, ((0, m_p - M), (0, din_p - din)))
    w_p = w
    if din_p != din or dout_p != dout:
        w_p = jnp.pad(w, ((0, din_p - din), (0, dout_p - dout)))

    def _pad_vec(v):
        v = v.reshape(1, dout)
        if dout_p != dout:
            v = jnp.pad(v, ((0, 0), (0, dout_p - dout)))
        return v

    b_p, g_p, be_p = _pad_vec(b), _pad_vec(gamma), _pad_vec(beta)

    kernel = functools.partial(_prediction_head_kernel, eps=eps, dout=dout,
                               dout_pad=dout_p, sub_m=sub_m)

    cost = pl.CostEstimate(
        flops=int(2 * m_p * din_p * dout_p),
        transcendentals=int(m_p * dout_p),      # erf per output element
        bytes_accessed=int(m_p * din_p * x_isz + din_p * dout_p * w_isz
                           + 3 * dout_p * 4 + m_p * dout_p * o_isz),
    )

    out = pl.pallas_call(
        kernel,
        out_shape=jax.ShapeDtypeStruct((m_p, dout_p), x.dtype),
        grid_spec=pltpu.PrefetchScalarGridSpec(
            num_scalar_prefetch=0,
            grid=(m_p // tile_m,),
            in_specs=[
                # x tile: default double-buffered pipeline.
                pl.BlockSpec((tile_m, din_p), lambda i: (i, 0)),
                # Resident weight + params: constant index_map -> single buffer.
                pl.BlockSpec((din_p, dout_p), lambda i: (0, 0),
                             pipeline_mode=pl.Buffered(1)),
                pl.BlockSpec((1, dout_p), lambda i: (0, 0),
                             pipeline_mode=pl.Buffered(1)),
                pl.BlockSpec((1, dout_p), lambda i: (0, 0),
                             pipeline_mode=pl.Buffered(1)),
                pl.BlockSpec((1, dout_p), lambda i: (0, 0),
                             pipeline_mode=pl.Buffered(1)),
            ],
            out_specs=pl.BlockSpec((tile_m, dout_p), lambda i: (i, 0)),
        ),
        compiler_params=pltpu.CompilerParams(
            dimension_semantics=("parallel",),
            vmem_limit_bytes=vmem_limit,
        ),
        cost_estimate=cost,
    )(x_p, w_p, b_p, g_p, be_p)

    out = out[:M, :dout]
    return out.reshape(orig_shape[:-1] + (dout,))


def _reference(x, w, b, gamma, beta, eps=1e-12):
    h = jnp.einsum("...i,io->...o", x.astype(jnp.float32),
                   w.astype(jnp.float32)) + b
    h = h * 0.5 * (1.0 + lax.erf(h / math.sqrt(2.0)))
    u = jnp.mean(h, axis=-1, keepdims=True)
    s = jnp.mean((h - u) ** 2, axis=-1, keepdims=True)
    hn = (h - u) / jnp.sqrt(s + eps)
    return gamma * hn + beta


if __name__ == "__main__":
    key = jax.random.PRNGKey(0)
    batch, seq, hidden_in, hidden_out = 2, 8, 32, 32

    k_x, k_w, k_b, k_g, k_be = jax.random.split(key, 5)
    x = jax.random.normal(k_x, (batch, seq, hidden_in), dtype=jnp.float32)
    # PyTorch nn.Linear weight is (out, in); the kernel takes its transpose.
    w = jax.random.normal(k_w, (hidden_in, hidden_out), dtype=jnp.float32) * 0.05
    b = jax.random.normal(k_b, (hidden_out,), dtype=jnp.float32) * 0.01
    gamma = jnp.ones((hidden_out,), dtype=jnp.float32)
    beta = jnp.zeros((hidden_out,), dtype=jnp.float32)

    out = prediction_head_transform(x, w, b, gamma, beta)
    out = jax.block_until_ready(out)

    ref = _reference(x, w, b, gamma, beta)
    assert out.shape == (batch, seq, hidden_out)
    assert jnp.allclose(out, ref, atol=1e-4, rtol=1e-4), "mismatch vs reference"

    print("KERNEL_OK")
</pallas_src>

<mosaic_0001>
module attributes {stable_mosaic.version = 11 : i64} {
  func.func @_prediction_head_kernel(%arg0: i32, %arg1: memref<8x128xf32, #tpu.memory_space<vmem>>, %arg2: memref<128x128xf32, #tpu.memory_space<vmem>>, %arg3: memref<1x128xf32, #tpu.memory_space<vmem>>, %arg4: memref<1x128xf32, #tpu.memory_space<vmem>>, %arg5: memref<1x128xf32, #tpu.memory_space<vmem>>, %arg6: memref<8x128xf32, #tpu.memory_space<vmem>>) attributes {dimension_semantics = [#tpu.dimension_semantics<parallel>], iteration_bounds = array<i64: 2>, scalar_prefetch = 0 : i64, scratch_operands = 0 : i64, tpu.core_type = #tpu.core_type<tc>, window_params = [{transform_indices = @transform_0, window_bounds = array<i64: 8, 128>}, {pipeline_mode = #tpu.pipeline_mode<synchronous>, transform_indices = @transform_1, window_bounds = array<i64: 128, 128>}, {pipeline_mode = #tpu.pipeline_mode<synchronous>, transform_indices = @transform_2, window_bounds = array<i64: 1, 128>}, {pipeline_mode = #tpu.pipeline_mode<synchronous>, transform_indices = @transform_3, window_bounds = array<i64: 1, 128>}, {pipeline_mode = #tpu.pipeline_mode<synchronous>, transform_indices = @transform_4, window_bounds = array<i64: 1, 128>}, {transform_indices = @transform_5, window_bounds = array<i64: 8, 128>}]} {
    %c0 = arith.constant 0 : index
    %c0_0 = arith.constant 0 : index
    %0 = vector.load %arg3[%c0, %c0_0] : memref<1x128xf32, #tpu.memory_space<vmem>>, vector<1x128xf32>
    %c0_1 = arith.constant 0 : index
    %c0_2 = arith.constant 0 : index
    %1 = vector.load %arg4[%c0_1, %c0_2] : memref<1x128xf32, #tpu.memory_space<vmem>>, vector<1x128xf32>
    %c0_3 = arith.constant 0 : index
    %c0_4 = arith.constant 0 : index
    %2 = vector.load %arg5[%c0_3, %c0_4] : memref<1x128xf32, #tpu.memory_space<vmem>>, vector<1x128xf32>
    %c0_5 = arith.constant 0 : index
    %c0_6 = arith.constant 0 : index
    %3 = vector.load %arg1[%c0_5, %c0_6] : memref<8x128xf32, #tpu.memory_space<vmem>>, vector<8x128xf32>
    %c0_7 = arith.constant 0 : index
    %c0_8 = arith.constant 0 : index
    %4 = vector.load %arg2[%c0_7, %c0_8] : memref<128x128xf32, #tpu.memory_space<vmem>>, vector<128x128xf32>
    %cst = arith.constant dense<0.000000e+00> : vector<8x128xf32>
    %5 = tpu.matmul %3, %4, %cst {dimension_numbers = #tpu.dot_dimension_numbers<[1], [0], [0], [1], [0, 0, 1, 1], [], []>} : vector<8x128xf32>, vector<128x128xf32>, vector<8x128xf32> -> vector<8x128xf32>
    %6 = vector.broadcast %0 : vector<1x128xf32> to vector<8x128xf32>
    %7 = arith.addf %5, %6 : vector<8x128xf32>
    %cst_9 = arith.constant 0.707106769 : f32
    %8 = vector.broadcast %cst_9 : f32 to vector<8x128xf32>
    %9 = arith.mulf %7, %8 : vector<8x128xf32>
    %10 = math.erf %9 : vector<8x128xf32>
    %cst_10 = arith.constant 1.000000e+00 : f32
    %11 = vector.broadcast %cst_10 : f32 to vector<8x128xf32>
    %12 = arith.addf %11, %10 : vector<8x128xf32>
    %cst_11 = arith.constant 5.000000e-01 : f32
    %13 = vector.broadcast %cst_11 : f32 to vector<8x128xf32>
    %14 = arith.mulf %13, %12 : vector<8x128xf32>
    %15 = arith.mulf %7, %14 : vector<8x128xf32>
    %cst_12 = arith.constant dense<0.000000e+00> : vector<8xf32>
    %16 = vector.multi_reduction <add>, %15, %cst_12 [1] : vector<8x128xf32> to vector<8xf32>
    %17 = vector.shape_cast %16 : vector<8xf32> to vector<8x1xf32>
    %cst_13 = arith.constant 3.125000e-02 : f32
    %18 = vector.broadcast %cst_13 : f32 to vector<8x1xf32>
    %19 = arith.mulf %17, %18 : vector<8x1xf32>
    %20 = vector.broadcast %19 : vector<8x1xf32> to vector<8x128xf32>
    %21 = arith.subf %15, %20 : vector<8x128xf32>
    %22 = arith.mulf %21, %21 : vector<8x128xf32>
    %cst_14 = arith.constant dense<0.000000e+00> : vector<8xf32>
    %23 = vector.multi_reduction <add>, %22, %cst_14 [1] : vector<8x128xf32> to vector<8xf32>
    %24 = vector.shape_cast %23 : vector<8xf32> to vector<8x1xf32>
    %25 = arith.mulf %19, %19 : vector<8x1xf32>
    %cst_15 = arith.constant 9.600000e+01 : f32
    %26 = vector.broadcast %cst_15 : f32 to vector<8x1xf32>
    %27 = arith.mulf %26, %25 : vector<8x1xf32>
    %28 = arith.subf %24, %27 : vector<8x1xf32>
    %cst_16 = arith.constant 3.125000e-02 : f32
    %29 = vector.broadcast %cst_16 : f32 to vector<8x1xf32>
    %30 = arith.mulf %28, %29 : vector<8x1xf32>
    %cst_17 = arith.constant 9.99999996E-13 : f32
    %31 = vector.broadcast %cst_17 : f32 to vector<8x1xf32>
    %32 = arith.addf %30, %31 : vector<8x1xf32>
    %33 = math.rsqrt %32 : vector<8x1xf32>
    %34 = vector.broadcast %33 : vector<8x1xf32> to vector<8x128xf32>
    %35 = arith.mulf %21, %34 : vector<8x128xf32>
    %36 = vector.broadcast %1 : vector<1x128xf32> to vector<8x128xf32>
    %37 = arith.mulf %36, %35 : vector<8x128xf32>
    %38 = vector.broadcast %2 : vector<1x128xf32> to vector<8x128xf32>
    %39 = arith.addf %37, %38 : vector<8x128xf32>
    %c0_18 = arith.constant 0 : index
    %c0_19 = arith.constant 0 : index
    %40 = vector.load %arg6[%c0_18, %c0_19] : memref<8x128xf32, #tpu.memory_space<vmem>>, vector<8x128xf32>
    tpu.vector_store %arg6[%c0_18, %c0_19], %39 {strides = array<i32>} : memref<8x128xf32, #tpu.memory_space<vmem>>, vector<8x128xf32>,
    return
  }
  func.func @transform_0(%arg0: i32) -> (i32, i32) {
    %c0_i32 = arith.constant 0 : i32
    %c0_i32_0 = arith.constant 0 : i32
    return %arg0, %c0_i32 : i32, i32
  }
  func.func @transform_1(%arg0: i32) -> (i32, i32) {
    %c0_i32 = arith.constant 0 : i32
    %c0_i32_0 = arith.constant 0 : i32
    %c0_i32_1 = arith.constant 0 : i32
    return %c0_i32, %c0_i32_0 : i32, i32
  }
  func.func @transform_2(%arg0: i32) -> (i32, i32) {
    %c0_i32 = arith.constant 0 : i32
    %c0_i32_0 = arith.constant 0 : i32
    %c0_i32_1 = arith.constant 0 : i32
    return %c0_i32, %c0_i32_0 : i32, i32
  }
  func.func @transform_3(%arg0: i32) -> (i32, i32) {
    %c0_i32 = arith.constant 0 : i32
    %c0_i32_0 = arith.constant 0 : i32
    %c0_i32_1 = arith.constant 0 : i32
    return %c0_i32, %c0_i32_0 : i32, i32
  }
  func.func @transform_4(%arg0: i32) -> (i32, i32) {
    %c0_i32 = arith.constant 0 : i32
    %c0_i32_0 = arith.constant 0 : i32
    %c0_i32_1 = arith.constant 0 : i32
    return %c0_i32, %c0_i32_0 : i32, i32
  }
  func.func @transform_5(%arg0: i32) -> (i32, i32) {
    %c0_i32 = arith.constant 0 : i32
    %c0_i32_0 = arith.constant 0 : i32
    return %arg0, %c0_i32 : i32, i32
  }
}

</mosaic_0001>

<bundles_post_ra>
// kernel: tpu_custom_call.1
= control target key start
LH: loop header
LB: loop body
LE: loop exit
PB: predicated region body
PF: predicated region fallthrough
CT: control target
= control target key end

     0   :  { %10 = vsyncpa [#allocation3], 0  ;;  %s944_s0 = inlined_call_operand.hbm [shape: f32[16,128], index: 0, kind: input, shape index: {}]   ;;  %s945_s1 = inlined_call_operand.hbm [shape: f32[128,128], index: 1, kind: input, shape index: {}]   ;;  %s946_s2 = inlined_call_operand.vmem [shape: f32[1,128], index: 2, kind: input, shape index: {}]   ;;  %s947_s3 = inlined_call_operand.vmem [shape: f32[1,128], index: 3, kind: input, shape index: {}]   ;;  %s948_s4 = inlined_call_operand.vmem [shape: f32[1,128], index: 4, kind: input, shape index: {}]   ;;  %s949_s5 = inlined_call_operand.hbm [shape: f32[16,128], index: 5, kind: output, shape index: {}]  }
   0x1   :  { %12 = vsyncpa [#allocation3 + $0x1], 0 }
   0x2   :  { %13 = vsyncpa [#allocation6], 0 }
   0x3   :  { %14 = vsyncpa [#allocation4], 0 }
   0x4   :  { %16 = vsyncpa [#allocation4 + $0x1], 0  ;;  %s774_s18 = smov 0   ;;  %s776_s19 = smov 0  }
   0x5   :  { %s778_s20 = smov 0   ;;  %s780_s21 = smov 0  }
   0x6 LB: > { %s795_s22 = sadd.s32 4294967295, %s735_s21   ;;  %s479_s23 = sadd.s32 4294967294, %s735_s21   ;;  %s735_s21 = sphi %s780_s21, %s971_s21   ;;  %s731_s20 = sphi %s778_s20, %s970_s20   ;;  %s727_s19 = sphi %s776_s19, %s969_s19   ;;  %s723_s18 = sphi %s774_s18, %s968_s18  }
   0x7   : > { %p42_p0 = scmp.ne.s32.totalorder %s727_s19, %s723_s18  ;;  %p950_p1 = scmp.eq.s32.totalorder %s795_s22, 0 }
   0x8   : > { %p156_p3 = scmp.eq.s32.totalorder %s479_s23, 1  ;;  %p480_p5 = scmp.ge.s32.totalorder %s735_s21, 1 }
   0x9   : > { %p804_p4 = por %p950_p1, %p42_p0  ;;  %p163_p7 = scmp.lt.s32.totalorder %s735_s21, 3 }
   0xa   : > { %p809_p6 = por %p156_p3, %p42_p0  ;;  %s737_s27 = smov [#allocation5]  }
   0xb   : > { %s954_s24 = scalar_select %p804_p4, 1, 0 }
   0xc   : > { %s955_s25 = scalar_select %p809_p6, 1, 0 }
   0xd   : > { %p814_p8 = pnand %p480_p5, %p163_p7  ;;  %s175_s28 = sshll.u32 %s737_s27, 4  ;;  %s176_s28 = int_to_ptr.vmem [resolvable:$true] %s175_s28 }
   0xe   : > { %s828_s30 = sadd.s32 1, %s735_s21   ;;  %s29_s6 = sadd.s32 1, %s731_s20 }
   0xf   : > { %s956_s26 = scalar_select %p814_p8, 1, 0 }
  0x10   : > { %p556_p9 = pneg %p814_p8  ;;  %s26_s7 = ssub.s32 %s735_s21, %s828_s30 }
  0x11   : > { %s624_s8 = scalar_lea.vmem %s176_s28, 2048  ;;  %p632_p5 = scmp.lt.s32.totalorder %s176_s28, %s176_s28 }
  0x12   : > { %p823_p11 = pnand %p556_p9, %p950_p1  ;;  %p625_p13 = scmp.ne.s32.totalorder %s176_s28, %s624_s8 }
  0x13   : > { %p633_p7 = scmp.lt.s32.totalorder %s624_s8, %s624_s8 }
  0x14   : > { %p615_p12 = pneg %p823_p11 }
  0x15   : > { %p634_p10 = por %p633_p7, %p632_p5 }
  0x16   : > { %p627_p0 = pnand %p625_p13, %p615_p12 }
  0x18   : > { %p628_p3 = pneg %p627_p0 }
  0x1a   : > { %p635_p2 = pnand %p634_p10, %p628_p3 }
  0x1c   : > { %638 = shalt.err (!%p635_p2)
}
  0x1d   : > { %s738_s9 = smov 128   ;;  %s739_s10 = smov 8  }
  0x1e   : > { %559 = dma.hbm_to_vmem [thread:$0]  (!%p823_p11), %s945_s1, 2048, %s176_s28, [#allocation6], %s738_s9, %s738_s9, %s739_s10  }
  0x1f   : > { %p27_p9 = scmp.eq.s32.totalorder %s26_s7, 0  ;;  %p36_p12 = scmp.ne.s32.totalorder %s731_s20, %s727_s19 }
  0x20   : > { %p37_p10 = scmp.eq.s32.totalorder %s735_s21, 0  ;;  %p569_p2 = scmp.lt.s32.totalorder %s735_s21, 2 }
  0x21   : > { %s845_s13 = scalar_select %p27_p9, %s731_s20, %s29_s6  }
  0x22   : > { %p38_p13 = por %p37_p10, %p36_p12  ;;  %p958_p0 = scmp.eq.s32.totalorder %s795_s22, 1 }
  0x23   : > { %s198_s15 = sand.u32 1, %s731_s20   ;;  %s484_s16 = sshll.u32 %s735_s21, 7 }
  0x24   : > { %p849_p3 = por %p958_p0, %p36_p12  ;;  %s483_s17 = sshll.u32 %s198_s15, 3 }
  0x25   : > { %s858_s29 = scalar_lea.hbm %s944_s0, %s484_s16  ;;  %s202_s28 = scalar_lea.vmem [#allocation2], %s483_s17 }
  0x26   : > { %s959_s14 = scalar_select %p849_p3, 1, 0 }
  0x27   : > { %s209_s6 = sshll.u32 %s202_s28, 4  ;;  %p860_p11 = pnand %p569_p2, %p38_p13  ;;  %s210_s6 = int_to_ptr.vmem [resolvable:$true] %s209_s6 }
  0x28   : > { %s199_s8 = scalar_lea.sflag [#allocation3], %s198_s15  ;;  %s639_s9 = scalar_lea.hbm %s858_s29, 128 }
  0x29   : > { %p640_p5 = scmp.ne.s32.totalorder %s858_s29, %s639_s9  ;;  %p641_p7 = pneg %p860_p11 }
  0x2a   : > { %s644_s12 = scalar_lea.hbm %s944_s0, 256  ;;  %p645_p10 = scmp.lt.s32.totalorder %s858_s29, %s944_s0 }
  0x2b   : > { %p642_p9 = pnand %p641_p7, %p640_p5  ;;  %p646_p2 = scmp.lt.s32.totalorder %s644_s12, %s639_s9 }
  0x2d   : > { %p643_p12 = pneg %p642_p9  ;;  %p647_p13 = por %p646_p2, %p645_p10 }
  0x2f   : > { %p648_p0 = pnand %p647_p13, %p643_p12 }
  0x31   : > { %651 = shalt.err (!%p648_p0)
}
  0x32   : > { %s652_s23 = scalar_lea.vmem %s210_s6, 128  ;;  %s740_s15 = smov [#allocation2]  }
  0x33   : > { %p653_p1 = scmp.ne.s32.totalorder %s210_s6, %s652_s23  ;;  %s657_s27 = sshll.u32 %s740_s15, 4  ;;  %s658_s27 = int_to_ptr.vmem [resolvable:$false] %s657_s27 }
  0x34   : > { %s659_s28 = scalar_lea.vmem %s658_s27, 256  ;;  %p660_p5 = scmp.lt.s32.totalorder %s210_s6, %s658_s27 }
  0x35   : > { %p655_p6 = pnand %p653_p1, %p641_p7  ;;  %p661_p9 = scmp.lt.s32.totalorder %s659_s28, %s652_s23 }
  0x37   : > { %p656_p3 = pneg %p655_p6  ;;  %p662_p4 = por %p661_p9, %p660_p5 }
  0x39   : > { %p663_p8 = pnand %p662_p4, %p656_p3 }
  0x3b   : > { %666 = shalt.err (!%p663_p8)
}
  0x3c   : > { %563 = dma.hbm_to_vmem [thread:$0]  (!%p860_p11), %s858_s29, 128, %s210_s6, %s199_s8  }
  0x3d   : > { %p961_p12 = scmp.ne.s32.totalorder %s956_s26, 0 }
  0x3e   : > { %s881_s9 = sand.u32 (!%p961_p12), 1, %s727_s19   ;;  %p962_p1 = scmp.ne.s32.totalorder (!%p961_p12), %s954_s24, 0 }
  0x3f   : > { %218 = sbr.rel (%p961_p12) target bundleno = 643 (0x283), region = 40  ;;  %s486_s10 = sshll.u32 (!%p961_p12), %s881_s9, 3 }
  0x40   : > { %s221_s11 = scalar_lea.sflag (!%p961_p12), [#allocation3], %s881_s9  ;;  %s887_s12 = scalar_lea.vmem (!%p961_p12), [#allocation2], %s486_s10 }
  0x44   : > { %710 = dma.done.wait (%p962_p1), %s221_s11, 128  }
  0x45   : > { %712 = vsyncadd (%p962_p1), %s221_s11, 4294967168  ;;  %p963_p4 = scmp.eq.s32.totalorder %s795_s22, 0 }
  0x47   : > { %714 = dma.done.wait (%p963_p4), [#allocation6], 2048   ;;  %p964_p6 = pmov %p963_p4 }
  0x48   : > { %v741_v0 = vmov 0.0   ;;  %vm742_vm0 = vmmov 0   ;;  %v274_v1 = vld [vmem:[#allocation5 + $0x78] sm:$0xff]  ;;  %v273_v2 = vld [vmem:[#allocation5 + $0x70] sm:$0xff]  ;;  %v272_v3 = vld [vmem:[#allocation5 + $0x68] sm:$0xff]  ;;  %s493_s16 = sshll.u32 %s795_s22, 7 }
  0x49   : > { %716 = vsyncadd (%p964_p6), [#allocation6], 4294965248  ;;  %513 = vmatprep.subr.mxu0 %v741_v0  ;;  %545 = vmatprep.mubr.msk.f32.mxu0 %vm742_vm0, %v741_v0  ;;  %v271_v4 = vld [vmem:[#allocation5 + $0x60] sm:$0xff]  ;;  %v270_v5 = vld [vmem:[#allocation5 + $0x58] sm:$0xff]  ;;  %s254_s17 = scalar_lea.vmem [#allocation7], %s486_s10  ;;  %s397_s28 = scalar_lea.hbm %s949_s5, %s493_s16 }
  0x4a   : > { %514 = vmatpush3.msra.mxu0 %v274_v1  ;;  %v269_v6 = vld [vmem:[#allocation5 + $0x50] sm:$0xff]  ;;  %v268_v7 = vld [vmem:[#allocation5 + $0x48] sm:$0xff]  ;;  %v267_v8 = vld [vmem:[#allocation5 + $0x40] sm:$0xff]  ;;  %s399_s23 = sshll.u32 %s254_s17, 4  ;;  %s386_s11 = scalar_lea.sflag [#allocation4], %s881_s9  ;;  %s400_s23 = int_to_ptr.vmem [resolvable:$true] %s399_s23 }
  0x4b   : > { %515 = vmatprep.subr.mxu0 %v741_v0  ;;  %v266_v9 = vld [vmem:[#allocation5 + $0x38] sm:$0xff]  ;;  %v265_v10 = vld [vmem:[#allocation5 + $0x30] sm:$0xff]  ;;  %v264_v11 = vld [vmem:[#allocation5 + $0x28] sm:$0xff]  ;;  %p965_p3 = scmp.ne.s32.totalorder %s959_s14, 0  ;;  %s743_s24 = smov [#allocation7]  }
  0x4c   : > { %516 = vmatpush3.msra.mxu0 %v273_v2  ;;  %v263_v12 = vld [vmem:[#allocation5 + $0x20] sm:$0xff]  ;;  %v262_v13 = vld [vmem:[#allocation5 + $0x18] sm:$0xff]  ;;  %v261_v14 = vld [vmem:[#allocation5 + $0x10] sm:$0xff]  ;;  %s671_s26 = sshll.u32 %s743_s24, 4  ;;  %s672_s26 = int_to_ptr.vmem [resolvable:$false] %s671_s26 }
  0x4d   : > { %517 = vmatprep.subr.mxu0 %v741_v0  ;;  %v260_v15 = vld [vmem:[#allocation5 + $0x8] sm:$0xff]  ;;  %v259_v16 = vld [vmem:[#allocation5] sm:$0xff]  ;;  %v258_v17 = vld [vmem:[%s887_s12] sm:$0xff]  ;;  %s667_s12 = scalar_lea.vmem %s400_s23, 128  ;;  %s673_s22 = scalar_lea.vmem %s672_s26, 256 }
  0x4e   : > { %518 = vmatpush3.msra.mxu0 %v272_v3  ;;  %v489_v18 = vld [vmem:[%s946_s2] ss:$0 sm:$0xff]  ;;  %p668_p8 = scmp.ne.s32.totalorder %s400_s23, %s667_s12  ;;  %p674_p10 = scmp.lt.s32.totalorder %s400_s23, %s672_s26 }
  0x4f   : > { %519 = vmatprep.subr.mxu0 %v741_v0  ;;  %v490_v38 = vld [vmem:[%s947_s3] ss:$0 sm:$0xff]  ;;  %p675_p2 = scmp.lt.s32.totalorder %s673_s22, %s667_s12 }
  0x50   : > { %520 = vmatpush3.msra.mxu0 %v271_v4  ;;  %v491_v40 = vld [vmem:[%s948_s4] ss:$0 sm:$0xff]  ;;  %p669_p11 = pnand %p668_p8, %p965_p3 }
  0x51   : > { %521 = vmatprep.subr.mxu0 %v741_v0  ;;  %p676_p13 = por %p675_p2, %p674_p10 }
  0x52   : > { %522 = vmatpush3.msra.mxu0 %v270_v5  ;;  %p670_p7 = pneg %p669_p11 }
  0x53   : > { %523 = vmatprep.subr.mxu0 %v741_v0 }
  0x54   : > { %524 = vmatpush3.msra.mxu0 %v269_v6  ;;  %p677_p0 = pnand %p676_p13, %p670_p7 }
  0x55   : > { %525 = vmatprep.subr.mxu0 %v741_v0 }
  0x56   : > { %526 = vmatpush3.msra.mxu0 %v268_v7 }
  0x57   : > { %527 = vmatprep.subr.mxu0 %v741_v0 }
  0x58   : > { %528 = vmatpush3.msra.mxu0 %v267_v8 }
  0x59   : > { %529 = vmatprep.subr.mxu0 %v741_v0 }
  0x5a   : > { %530 = vmatpush3.msra.mxu0 %v266_v9 }
  0x5b   : > { %531 = vmatprep.subr.mxu0 %v741_v0 }
  0x5c   : > { %532 = vmatpush3.msra.mxu0 %v265_v10 }
  0x5d   : > { %533 = vmatprep.subr.mxu0 %v741_v0 }
  0x5e   : > { %534 = vmatpush3.msra.mxu0 %v264_v11 }
  0x5f   : > { %535 = vmatprep.subr.mxu0 %v741_v0 }
  0x60   : > { %536 = vmatpush3.msra.mxu0 %v263_v12 }
  0x61   : > { %537 = vmatprep.subr.mxu0 %v741_v0 }
  0x62   : > { %538 = vmatpush3.msra.mxu0 %v262_v13 }
  0x63   : > { %539 = vmatprep.subr.mxu0 %v741_v0 }
  0x64   : > { %540 = vmatpush3.msra.mxu0 %v261_v14 }
  0x65   : > { %541 = vmatprep.subr.mxu0 %v741_v0 }
  0x66   : > { %542 = vmatpush3.msra.mxu0 %v260_v15 }
  0x67   : > { %543 = vmatprep.subr.mxu0 %v741_v0 }
  0x68   : > { %544 = vmatpush3.msra.mxu0 %v259_v16 }
  0x69   : > { %546 = vmatmul.mubr.f32.vlgmr.msra.gmra.mxu0 %v258_v17 }
 0x129   : > { %v347_v19 = vpop.f32.mrf.mxu0 }
 0x12a   : > { %v348_v20 = vadd.f32 %v489_v18, %v347_v19 }
 0x12b   : > { %v547_v21 = vpop.f32.mrf.mxu0 }
 0x12c   : > { %v351_v22 = vmul.f32 0.70710677, %v348_v20 }
 0x12e   : > { %609 = verf.f32 %v351_v22 }
 0x13b   : > { %v610_v23 = vpop.eup %609 }
 0x13c   : > { %v353_v24 = vadd.f32 1.0, %v610_v23 }
 0x13e   : > { %v354_v25 = vmul.f32 0.5, %v353_v24 }
 0x140   : > { %v355_v26 = vmul.f32 %v354_v25, %v348_v20 }
 0x142   : > { %356 = vadd.xlane.f32.xlu0 %v355_v26 }
 0x1cb   : > { %v357_v27 = vpop.xlane.xlu0 %356 }
 0x1cc   : > { %v358_v28 = vmul.f32 0.03125, %v357_v27 }
 0x1ce   : > { %v359_v29 = vsub.f32 %v355_v26, %v358_v28  ;;  %v363_v31 = vmul.f32 %v358_v28, %v358_v28 }
 0x1d0   : > { %v360_v30 = vmul.f32 %v359_v29, %v359_v29  ;;  %v364_v32 = vmul.f32 96.0, %v363_v31 }
 0x1d2   : > { %361 = vadd.xlane.f32.xlu0 %v360_v30 }
 0x25b   : > { %v362_v33 = vpop.xlane.xlu0 %361 }
 0x25c   : > { %v365_v34 = vsub.f32 %v362_v33, %v364_v32 }
 0x25e   : > { %v366_v35 = vmul.f32 0.03125, %v365_v34 }
 0x260   : > { %v367_v36 = vadd.f32 1e-12, %v366_v35 }
 0x262   : > { %611 = vrsqrt.f32 %v367_v36 }
 0x26f   : > { %v612_v37 = vpop.eup %611 }
 0x270   : > { %v369_v39 = vmul.f32 %v612_v37, %v359_v29 }
 0x272   : > { %v376_v41 = vmul.f32 %v490_v38, %v369_v39 }
 0x274   : > { %v383_v42 = vadd.f32 %v491_v40, %v376_v41 }
 0x276   : > { %384 = vst [vmem:[%s254_s17] sm:$0xff] %v383_v42 }
 0x277   : > { %680 = shalt.err (!%p677_p0)
}
 0x278   : > { %s681_s10 = scalar_lea.hbm %s397_s28, 128  ;;  %s685_s6 = scalar_lea.hbm %s949_s5, 256 }
 0x279   : > { %p682_p5 = scmp.ne.s32.totalorder %s397_s28, %s681_s10  ;;  %p686_p1 = scmp.lt.s32.totalorder %s397_s28, %s949_s5 }
 0x27a   : > { %p687_p4 = scmp.lt.s32.totalorder %s685_s6, %s681_s10 }
 0x27b   : > { %p683_p9 = pnand %p682_p5, %p965_p3 }
 0x27c   : > { %p688_p6 = por %p687_p4, %p686_p1 }
 0x27d   : > { %p684_p12 = pneg %p683_p9 }
 0x27f   : > { %p689_p8 = pnand %p688_p6, %p684_p12 }
 0x281   : > { %692 = shalt.err (!%p689_p8)
}
 0x282   : > { %554 = dma.vmem_to_hbm [thread:$0]  (%p965_p3), %s400_s23, 128, %s397_s28, %s386_s11  }
 0x283 PF: > { %s411_s16 = sand.u32 1, %s723_s18   ;;  %p966_p11 = scmp.ne.s32.totalorder %s955_s25, 0 }
 0x284   : > { %p967_p7 = scmp.ge.s32.totalorder %s735_s21, 2  ;;  %s412_s17 = scalar_lea.sflag [#allocation4], %s411_s16 }
 0x286   : > { %p565_p10 = pnand %p967_p7, %p966_p11 }
 0x288   : > { %p566_p2 = pneg %p565_p10 }
 0x28a   : > { %718 = dma.done.wait (%p566_p2), %s412_s17, 128  }
 0x28b   : > { %720 = vsyncadd (%p566_p2), %s412_s17, 4294967168  ;;  %p19_p13 = scmp.ge.s32.totalorder %s828_s30, 4   ;;  %s968_s18 = smov %s727_s19 }
 0x28c   : > { %s969_s19 = smov %s731_s20  ;;  %s970_s20 = smov %s845_s13 }
 0x28d   : > { %s971_s21 = smov %s828_s30  ;;  %21 = sbr.rel (!%p19_p13) target bundleno = 6 (0x6), region = 89 }
 0x292   :  { %417 = vsyncpa [#allocation3], 1 }
 0x293   :  { %419 = vsyncpa [#allocation3 + $0x1], 1 }
 0x294   :  { %420 = vsyncpa [#allocation6], 1 }
 0x295   :  { %421 = vsyncpa [#allocation4], 1 }
 0x296   :  { %423 = vsyncpa [#allocation4 + $0x1], 1 }

</bundles_post_ra>
